<compile_context>
chip_gen: v7x
topology: tpu7x:2x2x1
jax: 0.10.0
libtpu: 0.0.40
codegen_flags: <defaults>
</compile_context>

<pallas_src>
import functools
import math

import jax
import jax.numpy as jnp
from jax.experimental import pallas as pl
from jax.experimental.pallas import tpu as pltpu


# ----------------------------------------------------------------------------
# Kernels
# ----------------------------------------------------------------------------
def _avg_small_kernel(pe_ref, out_ref):
    """Whole [N, F] array in one block: mean over axis 0 -> (1, F)."""
    n = pe_ref.shape[0]
    acc = jnp.sum(pe_ref[...].astype(jnp.float32), axis=0, keepdims=True)
    out_ref[...] = (acc * (1.0 / n)).astype(out_ref.dtype)


def _accum_tile(acc_ref, x):
    """Fold a (tn, tile_f) f32 tile into the resident accumulator.

    When tn is a multiple of 8 and the accumulator has 8 sublanes, the tile is
    reduced with pure vreg-wise VPU adds (no cross-sublane XLU work per step).
    """
    tn, tf = x.shape
    if acc_ref.shape[0] == 8 and tn % 8 == 0:
        acc_ref[...] += jnp.sum(x.reshape(tn // 8, 8, tf), axis=0)
    else:
        acc_ref[...] += jnp.sum(x, axis=0, keepdims=True)


def _avg_tiled_kernel(pe_ref, out_ref, acc_ref, *, n_total, tn, has_remainder):
    """Grid = (F_blocks [parallel], N_blocks [arbitrary/reduction, last])."""
    i = pl.program_id(1)              # reduction step over N
    n_steps = pl.num_programs(1)

    @pl.when(i == 0)
    def _():
        acc_ref[...] = jnp.zeros_like(acc_ref)

    if has_remainder:
        # Plain, unmasked accumulate on all non-final steps.
        @pl.when(i < n_steps - 1)
        def _():
            _accum_tile(acc_ref, pe_ref[...].astype(jnp.float32))

        # Mask only on the final (possibly padded) reduction step.
        @pl.when(i == n_steps - 1)
        def _():
            x = pe_ref[...].astype(jnp.float32)
            valid = n_total - i * tn
            row = jax.lax.broadcasted_iota(jnp.int32, x.shape, 0)
            _accum_tile(acc_ref, jnp.where(row < valid, x, 0.0))
    else:
        _accum_tile(acc_ref, pe_ref[...].astype(jnp.float32))

    @pl.when(i == n_steps - 1)
    def _():
        # One-time epilogue: cross-sublane reduce + 1/N scale + dtype cast.
        s = jnp.sum(acc_ref[...], axis=0, keepdims=True)
        out_ref[...] = (s * (1.0 / n_total)).astype(out_ref.dtype)


# ----------------------------------------------------------------------------
# Tiling helpers
# ----------------------------------------------------------------------------
_MAX_FULL_F = 64 * 1024        # full-F tiles up to 64K lanes (acc <= 2 MiB f32)
_MIN_ROW_BYTES = 1024          # min contiguous bytes per DMA row when splitting F


def _plan_f(f, itemsize):
    """Return (f_padded, tile_f).

    Full-F tiles (fully contiguous DMA rows, one F block) when F is modest;
    otherwise split F into 128-multiple lane tiles with >= _MIN_ROW_BYTES
    contiguous per row, preferring an even block count >= 2 (v7x 2-TC split of
    the parallel F axis).  F is padded to a multiple of 128 only when split.
    """
    if f <= _MAX_FULL_F:
        return f, f
    f_pad = ((f + 127) // 128) * 128
    max_tile = min(f_pad, _MAX_FULL_F)
    cands = [c for c in range(128, max_tile + 1, 128) if f_pad % c == 0]
    good = [c for c in cands
            if c * itemsize >= _MIN_ROW_BYTES and f_pad // c >= 2]
    if good:
        even = [c for c in good if (f_pad // c) % 2 == 0]
        return f_pad, (max(even) if even else max(good))
    return f_pad, max(cands)   # always contains 128


def _choose_tn(n, tile_f, itemsize, target_bytes):
    """Sublane tile: multiple of 8 (or full N) keeping the input tile near target."""
    tn = target_bytes // max(1, tile_f * itemsize)
    if tn >= n:
        return n
    tn = max(8, (tn // 8) * 8)
    return min(tn, n)


# ----------------------------------------------------------------------------
# Wrapper
# ----------------------------------------------------------------------------
def average_aggregator(point_estimate, displacements=None, *,
                       small_bytes=2 << 20, target_tile_bytes=8 << 20):
    """Pallas equivalent of AverageAggregator.forward: mean over axis 0."""
    del displacements  # unused by the reference module

    pe = jnp.asarray(point_estimate)
    if pe.ndim < 1 or pe.shape[0] == 0:
        raise ValueError("point_estimate must have a non-empty leading axis")

    n = pe.shape[0]
    trailing = pe.shape[1:]
    f = math.prod(trailing) if trailing else 1
    pe2 = pe.reshape(n, f)

    out_dtype = pe.dtype if jnp.issubdtype(pe.dtype, jnp.floating) else jnp.float32
    itemsize = jnp.dtype(pe2.dtype).itemsize

    # ---- tiny problem: single-step kernel over the whole array -------------
    if n * f * itemsize <= small_bytes:
        out = pl.pallas_call(
            _avg_small_kernel,
            out_shape=jax.ShapeDtypeStruct((1, f), out_dtype),
            in_specs=[pl.BlockSpec(memory_space=pltpu.MemorySpace.VMEM)],
            out_specs=pl.BlockSpec(memory_space=pltpu.MemorySpace.VMEM),
        )(pe2)
        return out.reshape(trailing)

    # ---- large problem: tiled reduction with resident f32 accumulator ------
    f_pad, tile_f = _plan_f(f, itemsize)
    if f_pad != f:
        # Cheap layout plumbing: zero-pad F to a multiple of 128; slice back below.
        pe2 = jnp.pad(pe2, ((0, 0), (0, f_pad - f)))

    tn = _choose_tn(n, tile_f, itemsize, target_tile_bytes)
    n_steps = pl.cdiv(n, tn)
    grid = (f_pad // tile_f, n_steps)   # (parallel over F, reduction over N last)

    acc_rows = 8 if tn % 8 == 0 else 1
    has_remainder = (n % tn != 0)

    tile_bytes = tn * tile_f * itemsize
    f32_tile_bytes = tn * tile_f * 4
    acc_bytes = acc_rows * tile_f * 4
    # 2x double-buffered input + possible f32 tile temporary + accumulator + margin;
    # explicit limit so v5e's 16 MiB scoped default never constrains the tile choice.
    vmem_limit = min(2 * tile_bytes + f32_tile_bytes + acc_bytes + (8 << 20),
                     48 << 20)

    kernel = functools.partial(
        _avg_tiled_kernel, n_total=n, tn=tn, has_remainder=has_remainder)

    out = pl.pallas_call(
        kernel,
        out_shape=jax.ShapeDtypeStruct((1, f_pad), out_dtype),
        grid_spec=pltpu.PrefetchScalarGridSpec(
            num_scalar_prefetch=0,
            grid=grid,
            in_specs=[pl.BlockSpec((tn, tile_f), lambda j, i: (i, j))],
            out_specs=pl.BlockSpec((1, tile_f), lambda j, i: (0, j)),
            scratch_shapes=[pltpu.VMEM((acc_rows, tile_f), jnp.float32)],
        ),
        compiler_params=pltpu.CompilerParams(
            dimension_semantics=("parallel", "arbitrary"),
            vmem_limit_bytes=int(vmem_limit),
        ),
    )(pe2)

    if f_pad != f:
        out = out[:, :f]
    return out.reshape(trailing)


# ----------------------------------------------------------------------------
# Self-test
# ----------------------------------------------------------------------------
if __name__ == "__main__":
    key = jax.random.PRNGKey(0)
    k1, k2, k3, k4, k5 = jax.random.split(key, 5)

    # --- 1) demo shapes from the module (small / single-step path) ----------
    N, B, D = 8, 4, 32
    point_estimate = jax.random.normal(k1, (N, B, D), dtype=jnp.float32)
    displacements = jax.random.normal(k2, (N, B, 2), dtype=jnp.float32)

    result = average_aggregator(point_estimate, displacements)
    jax.block_until_ready(result)
    ref = jnp.mean(point_estimate, axis=0)
    assert result.shape == (B, D)
    assert jnp.allclose(result, ref, atol=1e-5, rtol=1e-5), "small-path mismatch"

    # --- 2) tiled path, exact blocking (no remainder), f32 ------------------
    x2 = jax.random.normal(k3, (24, 2, 128), dtype=jnp.float32)
    r2 = average_aggregator(x2, None, small_bytes=0, target_tile_bytes=8 * 1024)
    jax.block_until_ready(r2)
    ref2 = jnp.mean(x2, axis=0)
    assert jnp.allclose(r2, ref2, atol=1e-5, rtol=1e-5), "tiled-path mismatch"

    # --- 3) tiled path, partial last block (gated mask) + native bf16 -------
    x3 = jax.random.normal(k4, (20, 2, 128), dtype=jnp.float32).astype(jnp.bfloat16)
    r3 = average_aggregator(x3, None, small_bytes=0, target_tile_bytes=8 * 1024)
    jax.block_until_ready(r3)
    ref3 = jnp.mean(x3.astype(jnp.float32), axis=0)
    assert r3.dtype == jnp.bfloat16
    assert jnp.allclose(r3.astype(jnp.float32), ref3, atol=1e-2, rtol=1e-2), \
        "tiled-path bf16 mismatch"

    # --- 4) tiled path with F split + lane padding (f > 64K, f % 128 != 0) --
    x4 = jax.random.normal(k5, (8, 65600), dtype=jnp.float32)
    r4 = average_aggregator(x4, None, small_bytes=0)
    jax.block_until_ready(r4)
    ref4 = jnp.mean(x4, axis=0)
    assert r4.shape == (65600,)
    assert jnp.allclose(r4, ref4, atol=1e-5, rtol=1e-5), "F-split/pad mismatch"

    print("KERNEL_OK")
</pallas_src>

<mosaic_0001>
module attributes {stable_mosaic.version = 11 : i64} {
  func.func @_avg_small_kernel(%arg0: memref<8x128xf32, #tpu.memory_space<vmem>>, %arg1: memref<1x128xf32, #tpu.memory_space<vmem>>) attributes {dimension_semantics = [], scalar_prefetch = 0 : i64, scratch_operands = 0 : i64, tpu.core_type = #tpu.core_type<tc>} {
    %c0 = arith.constant 0 : index
    %c0_0 = arith.constant 0 : index
    %0 = vector.load %arg0[%c0, %c0_0] : memref<8x128xf32, #tpu.memory_space<vmem>>, vector<8x128xf32>
    %cst = arith.constant dense<0.000000e+00> : vector<128xf32>
    %1 = vector.multi_reduction <add>, %0, %cst [0] : vector<8x128xf32> to vector<128xf32>
    %2 = vector.shape_cast %1 : vector<128xf32> to vector<1x128xf32>
    %cst_1 = arith.constant 1.250000e-01 : f32
    %3 = vector.broadcast %cst_1 : f32 to vector<1x128xf32>
    %4 = arith.mulf %2, %3 : vector<1x128xf32>
    %c0_2 = arith.constant 0 : index
    %c0_3 = arith.constant 0 : index
    %5 = vector.load %arg1[%c0_2, %c0_3] : memref<1x128xf32, #tpu.memory_space<vmem>>, vector<1x128xf32>
    tpu.vector_store %arg1[%c0_2, %c0_3], %4 {strides = array<i32>} : memref<1x128xf32, #tpu.memory_space<vmem>>, vector<1x128xf32>,
    return
  }
}

</mosaic_0001>

<bundles_post_ra>
// kernel: tpu_custom_call.1
= control target key start
LH: loop header
LB: loop body
LE: loop exit
PB: predicated region body
PF: predicated region fallthrough
CT: control target
= control target key end

     0   :  { %6 = vsyncpa [#allocation3], 0  ;;  %s131_s0 = inlined_call_operand.hbm [shape: f32[8,128], index: 0, kind: input, shape index: {}]   ;;  %s132_s1 = inlined_call_operand.hbm [shape: f32[1,128], index: 1, kind: output, shape index: {}]  }
   0x1   :  { %7 = vsyncpa [#allocation4], 0  ;;  %s95_s6 = smov [#allocation2]   ;;  %s47_s10 = scalar_lea.hbm %s131_s0, 128 }
   0x2   :  { %s14_s7 = sshll.u32 %s95_s6, 4  ;;  %p48_p0 = scmp.ne.s32.totalorder %s131_s0, %s47_s10  ;;  %s15_s7 = int_to_ptr.vmem [resolvable:$true] %s14_s7 }
   0x3   :  { %p51_p1 = scmp.lt.u32.totalorder %s47_s10, %s131_s0 }
   0x5   :  { %p53_p2 = pnand %p51_p1, %p48_p0 }
   0x7   :  { %56 = shalt.err (!%p53_p2)
}
   0x8   :  { %s57_s15 = scalar_lea.vmem %s15_s7, 128  ;;  %p62_p4 = scmp.lt.s32.totalorder %s15_s7, %s15_s7 }
   0x9   :  { %p58_p3 = scmp.ne.s32.totalorder %s15_s7, %s57_s15  ;;  %p63_p5 = scmp.lt.s32.totalorder %s57_s15, %s57_s15 }
   0xb   :  { %p64_p6 = por %p63_p5, %p62_p4 }
   0xd   :  { %p65_p7 = pnand %p64_p6, %p58_p3 }
   0xf   :  { %68 = shalt.err (!%p65_p7)
}
  0x10   :  { %17 = dma.hbm_to_vmem [thread:$0]  %s131_s0, 128, %s15_s7, [#allocation3]  }
  0x11   :  { %91 = dma.done.wait [#allocation3], 128  }
  0x12   :  { %92 = vsyncadd [#allocation3], 4294967168  ;;  %v21_v0 = vld [vmem:[#allocation2] sm:$0xff]  ;;  %s96_s18 = smov [#allocation5]  }
  0x13   :  { %v22_v1 = vrot.slane %v21_v0, 4  ;;  %s36_s19 = sshll.u32 %s96_s18, 4  ;;  %s37_s19 = int_to_ptr.vmem [resolvable:$true] %s36_s19 }
  0x14   :  { %s69_s20 = scalar_lea.vmem %s37_s19, 16  ;;  %s73_s21 = scalar_lea.vmem %s37_s19, 32 }
  0x15   :  { %v23_v2 = vadd.f32 %v22_v1, %v21_v0  ;;  %p70_p8 = scmp.ne.s32.totalorder %s37_s19, %s69_s20  ;;  %p74_p9 = scmp.lt.s32.totalorder %s37_s19, %s37_s19 }
  0x16   :  { %p75_p10 = scmp.lt.s32.totalorder %s73_s21, %s69_s20 }
  0x17   :  { %v24_v3 = vrot.slane %v23_v2, 2 }
  0x18   :  { %p76_p11 = por %p75_p10, %p74_p9 }
  0x19   :  { %v25_v4 = vadd.f32 %v24_v3, %v23_v2 }
  0x1a   :  { %p77_p12 = pnand %p76_p11, %p70_p8 }
  0x1b   :  { %v26_v5 = vrot.slane %v25_v4, 1 }
  0x1d   :  { %v27_v6 = vadd.f32 %v26_v5, %v25_v4 }
  0x1f   :  { %v28_v7 = vmul.f32 0.125, %v27_v6 }
  0x21   :  { %29 = vst [vmem:[#allocation5] sm:$0x1] %v28_v7 }
  0x22   :  { %80 = shalt.err (!%p77_p12)
}
  0x23   :  { %s81_s23 = scalar_lea.hbm %s132_s1, 16 }
  0x24   :  { %p82_p13 = scmp.ne.s32.totalorder %s132_s1, %s81_s23  ;;  %p85_p0 = scmp.lt.u32.totalorder %s81_s23, %s132_s1 }
  0x26   :  { %p87_p1 = pnand %p85_p0, %p82_p13 }
  0x28   :  { %90 = shalt.err (!%p87_p1)
}
  0x29   :  { %39 = dma.vmem_to_hbm [thread:$0]  %s37_s19, 16, %s132_s1, [#allocation4]  }
  0x2a   :  { %93 = dma.done.wait [#allocation4], 16  }
  0x2b   :  { %94 = vsyncadd [#allocation4], 4294967280 }
  0x2c   :  { %43 = vsyncpa [#allocation3], 1 }
  0x2d   :  { %44 = vsyncpa [#allocation4], 1 }

</bundles_post_ra>
